<compile_context>
chip_gen: v7x
topology: tpu7x:2x2x1
jax: 0.10.0
libtpu: 0.0.40
codegen_flags: <defaults>
</compile_context>

<pallas_src>
import jax
import jax.numpy as jnp
from jax.experimental import pallas as pl
from jax.experimental.pallas import tpu as pltpu


def _dlinear_kernel(x_ref, w_ref, b_ref, o_ref):
    # x_ref: (TB, C, TN*L) input block (VMEM, lane-dense last dim)
    # w_ref: (C, TN*L, TN*H) folded weight (block-diagonal over nodes)
    # b_ref: (1, TN*H) fused total bias (f32)
    # o_ref: (TB, TN*H) lane-dense output slab
    C = x_ref.shape[1]
    acc = b_ref[...] + jnp.dot(x_ref[:, 0, :], w_ref[0],
                               preferred_element_type=jnp.float32)
    # C == in_dim is tiny by construction (feature1 is Linear(in_dim, 6)).
    # TODO(synk): switch to lax.fori_loop(..., unroll=True) if C ever grows >16.
    for c in range(1, C):
        acc = acc + jnp.dot(x_ref[:, c, :], w_ref[c],
                            preferred_element_type=jnp.float32)
    o_ref[...] = acc.astype(o_ref.dtype)


def _plan_tiles(B, C, N, L, H, in_itemsize, w_itemsize, budget_bytes):
    """Pick (TB, TN) so per-step live VMEM (double-buffered) fits the budget.

    Layout constraints (last two dims of each block must be (8,128)-aligned or
    equal the full array dims):
      * x block  (TB, C, TN*L): TN == N  or  (TN*L) % 128 == 0
      * out block (TB, TN*H)  : TB == B or TB % 8 == 0; TN == N or (TN*H)%128==0
    """
    def step_bytes(tb, tn):
        xb = tb * C * tn * L * in_itemsize            # input block
        ob = tb * tn * H * in_itemsize                # output block
        wb = C * tn * L * tn * H * w_itemsize         # folded weight
        bb = tn * H * 4                               # bias
        return 2 * (xb + ob + wb + bb)                # BlockSpec double-buffers

    tn_cands = [t for t in range(N, 0, -1) if N % t == 0 and
                (t == N or ((t * L) % 128 == 0 and (t * H) % 128 == 0))]
    tb_cands = [t for t in range(B, 0, -1) if B % t == 0 and
                (t == B or t % 8 == 0)]
    x_floor = 512 << 10      # ~512 KB of x per step amortizes per-step overhead

    for tn in tn_cands:
        fitting = [tb for tb in tb_cands if step_bytes(tb, tn) <= budget_bytes]
        if not fitting:
            continue
        chosen = max(fitting)            # biggest fitting block: HBM amortization
        # If we can stay above the block floor AND keep >=4 grid steps (two v7x
        # TensorCores + pipeline steady-state), prefer that.
        for tb in sorted(fitting):
            if (tb * C * tn * L * in_itemsize >= x_floor
                    and (B // tb) * (N // tn) >= 4):
                chosen = tb
                break
        return chosen, tn, step_bytes(chosen, tn)

    # Nothing fits the budget: smallest layout-valid tiles + raised vmem limit.
    # TODO(synk): add a contraction-axis (tiled-K) grid dim for extreme N*L
    #             where even the minimal tile exceeds VMEM.
    tn, tb = tn_cands[-1], tb_cands[-1]
    return tb, tn, step_bytes(tb, tn)


def dlinear_forward(x, params, ks):
    """x: (B, C, N, L). Returns (B, N, H) = DLinear.forward(x)[..., -1]."""
    assert ks % 2 == 1, "DLinear replication padding requires odd kernel_size"
    B, C, N, L = x.shape
    H = params["ws"].shape[0]
    pad = (ks - 1) // 2
    f32 = jnp.float32

    # ---- fold parameters (touches no per-input data) ----
    # Moving-average-with-replication-pad as an (L_in, L_out) matrix A.
    pos = jnp.clip(jnp.arange(L)[None, :] + jnp.arange(ks)[:, None] - pad,
                   0, L - 1)                                        # (ks, L_out)
    counts = (pos[:, None, :] == jnp.arange(L)[None, :, None]).sum(axis=0)
    A = counts.astype(f32) / ks                                     # (L_in, L_out)

    eye_l = jnp.eye(L, dtype=f32)
    ws_t = params["ws"].astype(f32).T                               # (L, H)
    wt_t = params["wt"].astype(f32).T                               # (L, H)
    w_comb = (eye_l - A) @ ws_t + A @ wt_t                          # (L, H)

    w1 = params["w1"].astype(f32)                                   # (6, C)
    w2 = params["w2"].astype(f32)                                   # (1, 6)
    w_eff = (w2 @ w1).reshape(C)                                    # (C,)
    b_eff = params["b2"].astype(f32)[0] + jnp.dot(w2[0], params["b1"].astype(f32))
    b_tot = (w_eff.sum() * (params["bs"].astype(f32) + params["bt"].astype(f32))
             + b_eff).reshape(1, H)                                 # (1, H)

    # ---- generation-aware VMEM planning ----
    try:
        vmem_cap = int(getattr(pltpu.get_tpu_info(), "vmem_capacity_bytes",
                               64 << 20))
    except Exception:
        vmem_cap = 64 << 20                     # conservative (v7x-sized) default
    budget = int(vmem_cap * 0.45)               # per-step live-VMEM target

    # bf16 inputs feed the MXU natively (weight in bf16, accumulate in f32).
    wk_dtype = jnp.bfloat16 if x.dtype == jnp.bfloat16 else f32
    w_isz = 2 if wk_dtype == jnp.bfloat16 else 4
    in_isz = x.dtype.itemsize
    TB, TN, est_bytes = _plan_tiles(B, C, N, L, H, in_isz, w_isz, budget)

    # ---- folded, node-block-diagonal kernel weight (C, TN*L, TN*H) ----
    eye_tn = jnp.eye(TN, dtype=f32)
    w_node = (eye_tn[:, None, :, None] * w_comb[None, :, None, :]
              ).reshape(TN * L, TN * H)                             # (TN*L, TN*H)
    w_full = (w_eff[:, None, None] * w_node[None]).astype(wk_dtype)  # (C,TNL,TNH)
    b_tile = jnp.tile(b_tot, (1, TN))                               # (1, TN*H)

    # ---- lane-dense input layout (free trailing-dim merge, no transpose) ----
    x3 = x.reshape(B, C, N * L)

    grid = (B // TB, N // TN)
    vmem_limit = int(min(vmem_cap * 0.8, max(2 * est_bytes, 32 << 20)))
    cost = pl.CostEstimate(
        flops=2 * B * C * N * L * TN * H,
        transcendentals=0,
        bytes_accessed=(B * C * N * L + B * N * H) * in_isz
        + C * TN * L * TN * H * w_isz,
    )

    out = pl.pallas_call(
        _dlinear_kernel,
        out_shape=jax.ShapeDtypeStruct((B, N * H), x.dtype),
        grid_spec=pltpu.PrefetchScalarGridSpec(
            num_scalar_prefetch=0,
            grid=grid,
            in_specs=[
                pl.BlockSpec((TB, C, TN * L), lambda b, n: (b, 0, n)),      # x
                pl.BlockSpec((C, TN * L, TN * H), lambda b, n: (0, 0, 0)),  # W
                pl.BlockSpec((1, TN * H), lambda b, n: (0, 0)),             # bias
            ],
            out_specs=pl.BlockSpec((TB, TN * H), lambda b, n: (b, n)),
        ),
        compiler_params=pltpu.CompilerParams(
            dimension_semantics=("parallel", "parallel"),
            vmem_limit_bytes=vmem_limit),
        cost_estimate=cost,
    )(x3, w_full, b_tile)
    return out.reshape(B, N, H)


def dlinear_reference(x, params, ks):
    """Pure-JAX reference reproducing the PyTorch forward exactly (unfused)."""
    L = x.shape[-1]
    pad = (ks - 1) // 2
    front = jnp.repeat(x[..., :1], pad, axis=-1)
    end = jnp.repeat(x[..., -1:], pad, axis=-1)
    xp = jnp.concatenate([front, x, end], axis=-1)
    mm = jnp.stack([xp[..., k:k + L] for k in range(ks)], axis=0).mean(axis=0)
    seasonal = x - mm
    so = seasonal @ params["ws"].T + params["bs"]
    to = mm @ params["wt"].T + params["bt"]
    y = so + to                                            # (B, C, N, H)
    y = jnp.transpose(y, (0, 2, 3, 1))                     # (B, N, H, C)
    z = y @ params["w1"].T + params["b1"]                  # (B, N, H, 6)
    z = z @ params["w2"].T + params["b2"]                  # (B, N, H, 1)
    return z[..., -1]                                      # (B, N, H)


def init_params(key, in_dim, input_len, output_len):
    """Deterministic parameter init matching the module's shapes."""
    k = jax.random.split(key, 6)
    L, H, C = input_len, output_len, in_dim
    params = {
        # Linear_Seasonal / Linear_Trend weights are 1/Lag * ones in __init__
        "ws": jnp.full((H, L), 1.0 / L, jnp.float32),
        "wt": jnp.full((H, L), 1.0 / L, jnp.float32),
        "bs": jax.random.uniform(k[0], (H,), jnp.float32, -1.0 / L ** 0.5, 1.0 / L ** 0.5),
        "bt": jax.random.uniform(k[1], (H,), jnp.float32, -1.0 / L ** 0.5, 1.0 / L ** 0.5),
        # feature1: Linear(in_dim, 6), feature2: Linear(6, 1)
        "w1": jax.random.uniform(k[2], (6, C), jnp.float32, -1.0 / C ** 0.5, 1.0 / C ** 0.5),
        "b1": jax.random.uniform(k[3], (6,), jnp.float32, -1.0 / C ** 0.5, 1.0 / C ** 0.5),
        "w2": jax.random.uniform(k[4], (1, 6), jnp.float32, -1.0 / 6 ** 0.5, 1.0 / 6 ** 0.5),
        "b2": jax.random.uniform(k[5], (1,), jnp.float32, -1.0 / 6 ** 0.5, 1.0 / 6 ** 0.5),
    }
    return params


if __name__ == "__main__":
    B, C, N, L, H, KS = 2, 4, 16, 8, 12, 3   # batch, in_dim, nodes, Lag, Horizon, ks

    key = jax.random.PRNGKey(0)
    kx, kp = jax.random.split(key)
    x = jax.random.normal(kx, (B, C, N, L), jnp.float32)
    params = init_params(kp, C, L, H)

    out = dlinear_forward(x, params, KS)
    out = jax.block_until_ready(out)

    ref = dlinear_reference(x, params, KS)
    assert out.shape == (B, N, H), out.shape
    assert jnp.allclose(out, ref, atol=1e-4, rtol=1e-4), \
        float(jnp.max(jnp.abs(out - ref)))

    print("KERNEL_OK")
</pallas_src>

<mosaic_0001>
module attributes {stable_mosaic.version = 11 : i64} {
  func.func @_dlinear_kernel(%arg0: i32, %arg1: i32, %arg2: memref<2x4x128xf32, #tpu.memory_space<vmem>>, %arg3: memref<4x128x192xf32, #tpu.memory_space<vmem>>, %arg4: memref<1x192xf32, #tpu.memory_space<vmem>>, %arg5: memref<2x192xf32, #tpu.memory_space<vmem>>) attributes {dimension_semantics = [#tpu.dimension_semantics<parallel>, #tpu.dimension_semantics<parallel>], iteration_bounds = array<i64: 1, 1>, scalar_prefetch = 0 : i64, scratch_operands = 0 : i64, tpu.core_type = #tpu.core_type<tc>, window_params = [{transform_indices = @transform_0, window_bounds = array<i64: 2, 4, 128>}, {pipeline_mode = #tpu.pipeline_mode<synchronous>, transform_indices = @transform_1, window_bounds = array<i64: 4, 128, 192>}, {pipeline_mode = #tpu.pipeline_mode<synchronous>, transform_indices = @transform_2, window_bounds = array<i64: 1, 192>}, {transform_indices = @transform_3, window_bounds = array<i64: 2, 192>}]} {
    %c0 = arith.constant 0 : index
    %c0_0 = arith.constant 0 : index
    %0 = vector.load %arg4[%c0, %c0_0] : memref<1x192xf32, #tpu.memory_space<vmem>>, vector<1x192xf32>
    %c0_1 = arith.constant 0 : index
    %c0_2 = arith.constant 0 : index
    %c0_3 = arith.constant 0 : index
    %1 = vector.load %arg2[%c0_1, %c0_2, %c0_3] : memref<2x4x128xf32, #tpu.memory_space<vmem>>, vector<2x1x128xf32>
    %2 = vector.shape_cast %1 : vector<2x1x128xf32> to vector<2x128xf32>
    %c0_4 = arith.constant 0 : index
    %c0_5 = arith.constant 0 : index
    %c0_6 = arith.constant 0 : index
    %3 = vector.load %arg3[%c0_4, %c0_5, %c0_6] : memref<4x128x192xf32, #tpu.memory_space<vmem>>, vector<1x128x192xf32>
    %4 = vector.shape_cast %3 : vector<1x128x192xf32> to vector<128x192xf32>
    %cst = arith.constant dense<0.000000e+00> : vector<2x192xf32>
    %5 = tpu.matmul %2, %4, %cst {dimension_numbers = #tpu.dot_dimension_numbers<[1], [0], [0], [1], [0, 0, 1, 1], [], []>} : vector<2x128xf32>, vector<128x192xf32>, vector<2x192xf32> -> vector<2x192xf32>
    %6 = vector.broadcast %0 : vector<1x192xf32> to vector<2x192xf32>
    %7 = arith.addf %6, %5 : vector<2x192xf32>
    %c0_7 = arith.constant 0 : index
    %c1 = arith.constant 1 : index
    %c0_8 = arith.constant 0 : index
    %8 = vector.load %arg2[%c0_7, %c1, %c0_8] : memref<2x4x128xf32, #tpu.memory_space<vmem>>, vector<2x1x128xf32>
    %9 = vector.shape_cast %8 : vector<2x1x128xf32> to vector<2x128xf32>
    %c1_9 = arith.constant 1 : index
    %c0_10 = arith.constant 0 : index
    %c0_11 = arith.constant 0 : index
    %10 = vector.load %arg3[%c1_9, %c0_10, %c0_11] : memref<4x128x192xf32, #tpu.memory_space<vmem>>, vector<1x128x192xf32>
    %11 = vector.shape_cast %10 : vector<1x128x192xf32> to vector<128x192xf32>
    %cst_12 = arith.constant dense<0.000000e+00> : vector<2x192xf32>
    %12 = tpu.matmul %9, %11, %cst_12 {dimension_numbers = #tpu.dot_dimension_numbers<[1], [0], [0], [1], [0, 0, 1, 1], [], []>} : vector<2x128xf32>, vector<128x192xf32>, vector<2x192xf32> -> vector<2x192xf32>
    %13 = arith.addf %7, %12 : vector<2x192xf32>
    %c0_13 = arith.constant 0 : index
    %c2 = arith.constant 2 : index
    %c0_14 = arith.constant 0 : index
    %14 = vector.load %arg2[%c0_13, %c2, %c0_14] : memref<2x4x128xf32, #tpu.memory_space<vmem>>, vector<2x1x128xf32>
    %15 = vector.shape_cast %14 : vector<2x1x128xf32> to vector<2x128xf32>
    %c2_15 = arith.constant 2 : index
    %c0_16 = arith.constant 0 : index
    %c0_17 = arith.constant 0 : index
    %16 = vector.load %arg3[%c2_15, %c0_16, %c0_17] : memref<4x128x192xf32, #tpu.memory_space<vmem>>, vector<1x128x192xf32>
    %17 = vector.shape_cast %16 : vector<1x128x192xf32> to vector<128x192xf32>
    %cst_18 = arith.constant dense<0.000000e+00> : vector<2x192xf32>
    %18 = tpu.matmul %15, %17, %cst_18 {dimension_numbers = #tpu.dot_dimension_numbers<[1], [0], [0], [1], [0, 0, 1, 1], [], []>} : vector<2x128xf32>, vector<128x192xf32>, vector<2x192xf32> -> vector<2x192xf32>
    %19 = arith.addf %13, %18 : vector<2x192xf32>
    %c0_19 = arith.constant 0 : index
    %c3 = arith.constant 3 : index
    %c0_20 = arith.constant 0 : index
    %20 = vector.load %arg2[%c0_19, %c3, %c0_20] : memref<2x4x128xf32, #tpu.memory_space<vmem>>, vector<2x1x128xf32>
    %21 = vector.shape_cast %20 : vector<2x1x128xf32> to vector<2x128xf32>
    %c3_21 = arith.constant 3 : index
    %c0_22 = arith.constant 0 : index
    %c0_23 = arith.constant 0 : index
    %22 = vector.load %arg3[%c3_21, %c0_22, %c0_23] : memref<4x128x192xf32, #tpu.memory_space<vmem>>, vector<1x128x192xf32>
    %23 = vector.shape_cast %22 : vector<1x128x192xf32> to vector<128x192xf32>
    %cst_24 = arith.constant dense<0.000000e+00> : vector<2x192xf32>
    %24 = tpu.matmul %21, %23, %cst_24 {dimension_numbers = #tpu.dot_dimension_numbers<[1], [0], [0], [1], [0, 0, 1, 1], [], []>} : vector<2x128xf32>, vector<128x192xf32>, vector<2x192xf32> -> vector<2x192xf32>
    %25 = arith.addf %19, %24 : vector<2x192xf32>
    %c0_25 = arith.constant 0 : index
    %c0_26 = arith.constant 0 : index
    %26 = vector.load %arg5[%c0_25, %c0_26] : memref<2x192xf32, #tpu.memory_space<vmem>>, vector<2x192xf32>
    tpu.vector_store %arg5[%c0_25, %c0_26], %25 {strides = array<i32>} : memref<2x192xf32, #tpu.memory_space<vmem>>, vector<2x192xf32>,
    return
  }
  func.func @transform_0(%arg0: i32, %arg1: i32) -> (i32, i32, i32) {
    %c0_i32 = arith.constant 0 : i32
    %c0_i32_0 = arith.constant 0 : i32
    return %arg0, %c0_i32, %arg1 : i32, i32, i32
  }
  func.func @transform_1(%arg0: i32, %arg1: i32) -> (i32, i32, i32) {
    %c0_i32 = arith.constant 0 : i32
    %c0_i32_0 = arith.constant 0 : i32
    %c0_i32_1 = arith.constant 0 : i32
    %c0_i32_2 = arith.constant 0 : i32
    return %c0_i32, %c0_i32_0, %c0_i32_1 : i32, i32, i32
  }
  func.func @transform_2(%arg0: i32, %arg1: i32) -> (i32, i32) {
    %c0_i32 = arith.constant 0 : i32
    %c0_i32_0 = arith.constant 0 : i32
    %c0_i32_1 = arith.constant 0 : i32
    return %c0_i32, %c0_i32_0 : i32, i32
  }
  func.func @transform_3(%arg0: i32, %arg1: i32) -> (i32, i32) {
    %c0_i32 = arith.constant 0 : i32
    return %arg0, %arg1 : i32, i32
  }
}

</mosaic_0001>

<bundles_post_ra>
// kernel: tpu_custom_call.1
= control target key start
LH: loop header
LB: loop body
LE: loop exit
PB: predicated region body
PF: predicated region fallthrough
CT: control target
= control target key end

     0   :  { %v767_v7 = vmov 0.0   ;;  %vm53_vm0 = vcmask 1041409   ;;  %s1221_s0 = inlined_call_operand.vmem [shape: f32[2,4,128], index: 0, kind: input, shape index: {}]   ;;  %s1222_s1 = inlined_call_operand.vmem [shape: f32[4,128,192], index: 1, kind: input, shape index: {}]   ;;  %s1223_s2 = inlined_call_operand.vmem [shape: f32[1,192], index: 2, kind: input, shape index: {}]   ;;  %s1224_s3 = inlined_call_operand.hbm [shape: f32[2,192], index: 3, kind: output, shape index: {}]  }
   0x1   :  { %v19_v0 = vld [vmem:[%s1222_s1 + $0x8] sm:$0xff]  ;;  %v21_v1 = vld [vmem:[%s1222_s1 + $0x18] sm:$0xff]  ;;  %v18_v5 = vld [vmem:[%s1222_s1] sm:$0xff]  ;;  %120 = vmatprep.mubr.f32.mxu1 %v767_v7  ;;  %357 = vmatprep.mubr.f32.mxu0 %v767_v7 }
   0x2   :  { %v541_v2 = vld [vmem:[%s1222_s1 + $0x208] sm:$0xff]  ;;  %v604_v3 = vpack.c.bf16 %v21_v1, %v19_v0  ;;  %v543_v4 = vld [vmem:[%s1222_s1 + $0x218] sm:$0xff]  ;;  %v20_v6 = vld [vmem:[%s1222_s1 + $0x10] sm:$0xff] }
   0x3   :  { %v668_v8 = vpack.c.bf16 %v543_v4, %v541_v2  ;;  %v606_v9 = vpack.c.bf16 %v20_v6, %v18_v5  ;;  %v540_v10 = vld [vmem:[%s1222_s1 + $0x200] sm:$0xff]  ;;  %v542_v11 = vld [vmem:[%s1222_s1 + $0x210] sm:$0xff]  ;;  %v23_v12 = vld [vmem:[%s1222_s1 + $0x28] sm:$0xff] }
   0x4   :  { %605 = vmatprep.subr.bf16.mxu1 %v604_v3  ;;  %v670_v13 = vpack.c.bf16 %v542_v11, %v540_v10  ;;  %v25_v14 = vld [vmem:[%s1222_s1 + $0x38] sm:$0xff]  ;;  %v545_v15 = vld [vmem:[%s1222_s1 + $0x228] sm:$0xff]  ;;  %v22_v19 = vld [vmem:[%s1222_s1 + $0x20] sm:$0xff] }
   0x5   :  { %v547_v16 = vld [vmem:[%s1222_s1 + $0x238] sm:$0xff]  ;;  %669 = vmatprep.subr.bf16.mxu0 %v668_v8  ;;  %607 = vmatpush1.bf16.msra.mxu1 %v606_v9  ;;  %v608_v17 = vpack.c.bf16 %v25_v14, %v23_v12  ;;  %v24_v20 = vld [vmem:[%s1222_s1 + $0x30] sm:$0xff]  ;;  %v544_v21 = vld [vmem:[%s1222_s1 + $0x220] sm:$0xff] }
   0x6   :  { %v672_v18 = vpack.c.bf16 %v547_v16, %v545_v15  ;;  %671 = vmatpush1.bf16.msra.mxu0 %v670_v13  ;;  %v610_v22 = vpack.c.bf16 %v24_v20, %v22_v19  ;;  %v546_v23 = vld [vmem:[%s1222_s1 + $0x230] sm:$0xff]  ;;  %v27_v24 = vld [vmem:[%s1222_s1 + $0x48] sm:$0xff]  ;;  %v29_v25 = vld [vmem:[%s1222_s1 + $0x58] sm:$0xff] }
   0x7   :  { %609 = vmatprep.subr.bf16.mxu1 %v608_v17  ;;  %v674_v26 = vpack.c.bf16 %v546_v23, %v544_v21  ;;  %v612_v27 = vpack.c.bf16 %v29_v25, %v27_v24  ;;  %v549_v28 = vld [vmem:[%s1222_s1 + $0x248] sm:$0xff]  ;;  %v551_v29 = vld [vmem:[%s1222_s1 + $0x258] sm:$0xff]  ;;  %v26_v30 = vld [vmem:[%s1222_s1 + $0x40] sm:$0xff] }
   0x8   :  { %673 = vmatprep.subr.bf16.mxu0 %v672_v18  ;;  %v676_v31 = vpack.c.bf16 %v551_v29, %v549_v28  ;;  %v28_v32 = vld [vmem:[%s1222_s1 + $0x50] sm:$0xff]  ;;  %v548_v33 = vld [vmem:[%s1222_s1 + $0x240] sm:$0xff]  ;;  %v31_v36 = vld [vmem:[%s1222_s1 + $0x68] sm:$0xff] }
   0x9   :  { %v550_v34 = vld [vmem:[%s1222_s1 + $0x250] sm:$0xff]  ;;  %611 = vmatpush1.bf16.msra.mxu1 %v610_v22  ;;  %v614_v35 = vpack.c.bf16 %v28_v32, %v26_v30  ;;  %v33_v37 = vld [vmem:[%s1222_s1 + $0x78] sm:$0xff]  ;;  %v553_v38 = vld [vmem:[%s1222_s1 + $0x268] sm:$0xff] }
   0xa   :  { %675 = vmatpush1.bf16.msra.mxu0 %v674_v26  ;;  %613 = vmatprep.subr.bf16.mxu1 %v612_v27  ;;  %v678_v39 = vpack.c.bf16 %v550_v34, %v548_v33  ;;  %v616_v40 = vpack.c.bf16 %v33_v37, %v31_v36  ;;  %v555_v41 = vld [vmem:[%s1222_s1 + $0x278] sm:$0xff]  ;;  %v30_v42 = vld [vmem:[%s1222_s1 + $0x60] sm:$0xff]  ;;  %v32_v43 = vld [vmem:[%s1222_s1 + $0x70] sm:$0xff] }
   0xb   :  { %677 = vmatprep.subr.bf16.mxu0 %v676_v31  ;;  %v680_v44 = vpack.c.bf16 %v555_v41, %v553_v38  ;;  %v552_v45 = vld [vmem:[%s1222_s1 + $0x260] sm:$0xff]  ;;  %v554_v46 = vld [vmem:[%s1222_s1 + $0x270] sm:$0xff]  ;;  %v35_v47 = vld [vmem:[%s1222_s1 + $0x88] sm:$0xff]  ;;  %v618_v51 = vpack.c.bf16 %v32_v43, %v30_v42 }
   0xc   :  { %v37_v48 = vld [vmem:[%s1222_s1 + $0x98] sm:$0xff]  ;;  %v557_v49 = vld [vmem:[%s1222_s1 + $0x288] sm:$0xff]  ;;  %v682_v52 = vpack.c.bf16 %v554_v46, %v552_v45  ;;  %v34_v54 = vld [vmem:[%s1222_s1 + $0x80] sm:$0xff] }
   0xd   :  { %v559_v50 = vld [vmem:[%s1222_s1 + $0x298] sm:$0xff]  ;;  %615 = vmatpush1.bf16.msra.mxu1 %v614_v35  ;;  %v620_v53 = vpack.c.bf16 %v37_v48, %v35_v47  ;;  %v36_v55 = vld [vmem:[%s1222_s1 + $0x90] sm:$0xff]  ;;  %v556_v56 = vld [vmem:[%s1222_s1 + $0x280] sm:$0xff] }
   0xe   :  { %679 = vmatpush1.bf16.msra.mxu0 %v678_v39  ;;  %617 = vmatprep.subr.bf16.mxu1 %v616_v40  ;;  %v684_v57 = vpack.c.bf16 %v559_v50, %v557_v49  ;;  %v558_v58 = vld [vmem:[%s1222_s1 + $0x290] sm:$0xff]  ;;  %v39_v59 = vld [vmem:[%s1222_s1 + $0xa8] sm:$0xff]  ;;  %v41_v60 = vld [vmem:[%s1222_s1 + $0xb8] sm:$0xff]  ;;  %v622_v63 = vpack.c.bf16 %v36_v55, %v34_v54 }
   0xf   :  { %681 = vmatprep.subr.bf16.mxu0 %v680_v44  ;;  %v561_v61 = vld [vmem:[%s1222_s1 + $0x2a8] sm:$0xff]  ;;  %v563_v62 = vld [vmem:[%s1222_s1 + $0x2b8] sm:$0xff]  ;;  %v686_v0 = vpack.c.bf16 %v558_v58, %v556_v56  ;;  %v624_v1 = vpack.c.bf16 %v41_v60, %v39_v59  ;;  %v38_v2 = vld [vmem:[%s1222_s1 + $0xa0] sm:$0xff] }
  0x10   :  { %v40_v3 = vld [vmem:[%s1222_s1 + $0xb0] sm:$0xff]  ;;  %v560_v4 = vld [vmem:[%s1222_s1 + $0x2a0] sm:$0xff]  ;;  %v688_v5 = vpack.c.bf16 %v563_v62, %v561_v61  ;;  %v43_v8 = vld [vmem:[%s1222_s1 + $0xc8] sm:$0xff] }
  0x11   :  { %619 = vmatpush1.bf16.msra.mxu1 %v618_v51  ;;  %v562_v6 = vld [vmem:[%s1222_s1 + $0x2b0] sm:$0xff]  ;;  %v45_v9 = vld [vmem:[%s1222_s1 + $0xd8] sm:$0xff]  ;;  %v565_v10 = vld [vmem:[%s1222_s1 + $0x2c8] sm:$0xff]  ;;  %v626_v12 = vpack.c.bf16 %v40_v3, %v38_v2 }
  0x12   :  { %683 = vmatpush1.bf16.msra.mxu0 %v682_v52  ;;  %621 = vmatprep.subr.bf16.mxu1 %v620_v53  ;;  %v567_v11 = vld [vmem:[%s1222_s1 + $0x2d8] sm:$0xff]  ;;  %v690_v13 = vpack.c.bf16 %v562_v6, %v560_v4  ;;  %v628_v14 = vpack.c.bf16 %v45_v9, %v43_v8  ;;  %v42_v15 = vld [vmem:[%s1222_s1 + $0xc0] sm:$0xff]  ;;  %v44_v16 = vld [vmem:[%s1222_s1 + $0xd0] sm:$0xff] }
  0x13   :  { %685 = vmatprep.subr.bf16.mxu0 %v684_v57  ;;  %v564_v17 = vld [vmem:[%s1222_s1 + $0x2c0] sm:$0xff]  ;;  %v692_v18 = vpack.c.bf16 %v567_v11, %v565_v10  ;;  %v566_v19 = vld [vmem:[%s1222_s1 + $0x2d0] sm:$0xff]  ;;  %v47_v20 = vld [vmem:[%s1222_s1 + $0xe8] sm:$0xff]  ;;  %v630_v24 = vpack.c.bf16 %v44_v16, %v42_v15 }
  0x14   :  { %v49_v21 = vld [vmem:[%s1222_s1 + $0xf8] sm:$0xff]  ;;  %v569_v22 = vld [vmem:[%s1222_s1 + $0x2e8] sm:$0xff]  ;;  %v46_v25 = vld [vmem:[%s1222_s1 + $0xe0] sm:$0xff]  ;;  %v694_v27 = vpack.c.bf16 %v566_v19, %v564_v17 }
  0x15   :  { %623 = vmatpush1.bf16.msra.mxu1 %v622_v63  ;;  %v571_v23 = vld [vmem:[%s1222_s1 + $0x2f8] sm:$0xff]  ;;  %v48_v26 = vld [vmem:[%s1222_s1 + $0xf0] sm:$0xff]  ;;  %v632_v28 = vpack.c.bf16 %v49_v21, %v47_v20  ;;  %v568_v29 = vld [vmem:[%s1222_s1 + $0x2e0] sm:$0xff] }
  0x16   :  { %687 = vmatpush1.bf16.msra.mxu0 %v686_v0  ;;  %625 = vmatprep.subr.bf16.mxu1 %v624_v1  ;;  %v570_v30 = vld [vmem:[%s1222_s1 + $0x2f0] sm:$0xff]  ;;  %v17_v31 = vld [vmem:[%s1221_s0 + $0x4] sm:$0x1]  ;;  %v696_v32 = vpack.c.bf16 %v571_v23, %v569_v22  ;;  %v509_v33 = vld [vmem:[%s1222_s1 + $0x108] sm:$0xff]  ;;  %v634_v38 = vpack.c.bf16 %v48_v26, %v46_v25 }
  0x17   :  { %689 = vmatprep.subr.bf16.mxu0 %v688_v5  ;;  %v511_v34 = vld [vmem:[%s1222_s1 + $0x118] sm:$0xff]  ;;  %v254_v35 = vld [vmem:[%s1221_s0 + $0x6] sm:$0x1]  ;;  %v573_v36 = vld [vmem:[%s1222_s1 + $0x308] sm:$0xff]  ;;  %v52_v40 = vrot.slane %v17_v31, 7  ;;  %v698_v42 = vpack.c.bf16 %v570_v30, %v568_v29 }
  0x18   :  { %v575_v37 = vld [vmem:[%s1222_s1 + $0x318] sm:$0xff]  ;;  %v16_v39 = vld [vmem:[%s1221_s0] sm:$0x1]  ;;  %v636_v43 = vpack.c.bf16 %v511_v34, %v509_v33  ;;  %v510_v44 = vld [vmem:[%s1222_s1 + $0x110] sm:$0xff]  ;;  %v290_v46 = vrot.slane %v254_v35, 7 }
  0x19   :  { %627 = vmatpush1.bf16.msra.mxu1 %v626_v12  ;;  %v508_v41 = vld [vmem:[%s1222_s1 + $0x100] sm:$0xff]  ;;  %v700_v48 = vpack.c.bf16 %v575_v37, %v573_v36  ;;  %v574_v49 = vld [vmem:[%s1222_s1 + $0x310] sm:$0xff]  ;;  %v513_v50 = vld [vmem:[%s1222_s1 + $0x128] sm:$0xff]  ;;  %v54_v54 = vsel %vm53_vm0, %v52_v40, %v16_v39 }
  0x1a   :  { %691 = vmatpush1.bf16.msra.mxu0 %v690_v13  ;;  %629 = vmatprep.subr.bf16.mxu1 %v628_v14  ;;  %v253_v45 = vld [vmem:[%s1221_s0 + $0x2] sm:$0x1]  ;;  %v515_v51 = vld [vmem:[%s1222_s1 + $0x138] sm:$0xff]  ;;  %v577_v52 = vld [vmem:[%s1222_s1 + $0x328] sm:$0xff]  ;;  %v638_v55 = vpack.c.bf16 %v510_v44, %v508_v41 }
  0x1b   :  { %693 = vmatprep.subr.bf16.mxu0 %v692_v18  ;;  %v572_v47 = vld [vmem:[%s1222_s1 + $0x300] sm:$0xff]  ;;  %v579_v53 = vld [vmem:[%s1222_s1 + $0x338] sm:$0xff]  ;;  %v291_v56 = vsel %vm53_vm0, %v290_v46, %v253_v45  ;;  %v640_v58 = vpack.c.bf16 %v515_v51, %v513_v50  ;;  %v514_v60 = vld [vmem:[%s1222_s1 + $0x130] sm:$0xff] }
  0x1c   :  { %v702_v57 = vpack.c.bf16 %v574_v49, %v572_v47  ;;  %v512_v59 = vld [vmem:[%s1222_s1 + $0x120] sm:$0xff]  ;;  %v704_v62 = vpack.c.bf16 %v579_v53, %v577_v52  ;;  %v578_v63 = vld [vmem:[%s1222_s1 + $0x330] sm:$0xff]  ;;  %v517_v0 = vld [vmem:[%s1222_s1 + $0x148] sm:$0xff] }
  0x1d   :  { %631 = vmatpush1.bf16.msra.mxu1 %v630_v24  ;;  %v576_v61 = vld [vmem:[%s1222_s1 + $0x320] sm:$0xff]  ;;  %v519_v1 = vld [vmem:[%s1222_s1 + $0x158] sm:$0xff]  ;;  %v581_v2 = vld [vmem:[%s1222_s1 + $0x348] sm:$0xff]  ;;  %v642_v4 = vpack.c.bf16 %v514_v60, %v512_v59 }
  0x1e   :  { %695 = vmatpush1.bf16.msra.mxu0 %v694_v27  ;;  %633 = vmatprep.subr.bf16.mxu1 %v632_v28  ;;  %v583_v3 = vld [vmem:[%s1222_s1 + $0x358] sm:$0xff]  ;;  %v706_v5 = vpack.c.bf16 %v578_v63, %v576_v61  ;;  %v644_v6 = vpack.c.bf16 %v519_v1, %v517_v0  ;;  %v516_v8 = vld [vmem:[%s1222_s1 + $0x140] sm:$0xff]  ;;  %v518_v9 = vld [vmem:[%s1222_s1 + $0x150] sm:$0xff] }
  0x1f   :  { %697 = vmatprep.subr.bf16.mxu0 %v696_v32  ;;  %v580_v10 = vld [vmem:[%s1222_s1 + $0x340] sm:$0xff]  ;;  %v708_v11 = vpack.c.bf16 %v583_v3, %v581_v2  ;;  %v582_v12 = vld [vmem:[%s1222_s1 + $0x350] sm:$0xff]  ;;  %v521_v13 = vld [vmem:[%s1222_s1 + $0x168] sm:$0xff]  ;;  %v646_v17 = vpack.c.bf16 %v518_v9, %v516_v8 }
  0x20   :  { %v523_v14 = vld [vmem:[%s1222_s1 + $0x178] sm:$0xff]  ;;  %v585_v15 = vld [vmem:[%s1222_s1 + $0x368] sm:$0xff]  ;;  %v710_v18 = vpack.c.bf16 %v582_v12, %v580_v10  ;;  %v520_v20 = vld [vmem:[%s1222_s1 + $0x160] sm:$0xff] }
  0x21   :  { %635 = vmatpush1.bf16.msra.mxu1 %v634_v38  ;;  %v587_v16 = vld [vmem:[%s1222_s1 + $0x378] sm:$0xff]  ;;  %v648_v19 = vpack.c.bf16 %v523_v14, %v521_v13  ;;  %v522_v21 = vld [vmem:[%s1222_s1 + $0x170] sm:$0xff]  ;;  %v584_v22 = vld [vmem:[%s1222_s1 + $0x360] sm:$0xff] }
  0x22   :  { %699 = vmatpush1.bf16.msra.mxu0 %v698_v42  ;;  %637 = vmatprep.subr.bf16.mxu1 %v636_v43  ;;  %v586_v23 = vld [vmem:[%s1222_s1 + $0x370] sm:$0xff]  ;;  %v525_v24 = vld [vmem:[%s1222_s1 + $0x188] sm:$0xff]  ;;  %v527_v25 = vld [vmem:[%s1222_s1 + $0x198] sm:$0xff]  ;;  %v650_v28 = vpack.c.bf16 %v522_v21, %v520_v20 }
  0x23   :  { %701 = vmatprep.subr.bf16.mxu0 %v700_v48  ;;  %v589_v26 = vld [vmem:[%s1222_s1 + $0x388] sm:$0xff]  ;;  %v591_v27 = vld [vmem:[%s1222_s1 + $0x398] sm:$0xff]  ;;  %v524_v29 = vld [vmem:[%s1222_s1 + $0x180] sm:$0xff]  ;;  %v714_v30 = vpack.c.bf16 %v586_v23, %v584_v22  ;;  %v652_v31 = vpack.c.bf16 %v527_v25, %v525_v24 }
  0x24   :  { %121 = vmatmul.mubr.f32.vlgmr.msra.gmra.mrb[0].mxu1 %v54_v54  ;;  %v526_v32 = vld [vmem:[%s1222_s1 + $0x190] sm:$0xff]  ;;  %v588_v33 = vld [vmem:[%s1222_s1 + $0x380] sm:$0xff]  ;;  %v716_v35 = vpack.c.bf16 %v591_v27, %v589_v26  ;;  %v529_v36 = vld [vmem:[%s1222_s1 + $0x1a8] sm:$0xff] }
  0x25   :  { %639 = vmatpush1.bf16.msra.mxu1 %v638_v55  ;;  %358 = vmatmul.mubr.f32.vlgmr.msra.gmra.mrb[0].mxu0 %v291_v56  ;;  %v590_v34 = vld [vmem:[%s1222_s1 + $0x390] sm:$0xff]  ;;  %v531_v37 = vld [vmem:[%s1222_s1 + $0x1b8] sm:$0xff] }
  0x26   :  { %703 = vmatpush1.bf16.msra.mxu0 %v702_v57  ;;  %641 = vmatprep.subr.bf16.mxu1 %v640_v58 }
  0x27   :  { %705 = vmatprep.subr.bf16.mxu0 %v704_v62  ;;  %244 = vmatprep.mubr.f32.mxu1 %v767_v7 }
  0x28   :  { %470 = vmatprep.mubr.f32.mxu0 %v767_v7  ;;  %v712_v7 = vpack.c.bf16 %v587_v16, %v585_v15 }
  0x29   :  { %643 = vmatpush1.bf16.msra.mxu1 %v642_v4 }
  0x2a   :  { %707 = vmatpush1.bf16.msra.mxu0 %v706_v5  ;;  %645 = vmatprep.subr.bf16.mxu1 %v644_v6 }
  0x2b   :  { %709 = vmatprep.subr.bf16.mxu0 %v708_v11 }
  0x2d   :  { %647 = vmatpush1.bf16.msra.mxu1 %v646_v17 }
  0x2e   :  { %711 = vmatpush1.bf16.msra.mxu0 %v710_v18  ;;  %649 = vmatprep.subr.bf16.mxu1 %v648_v19 }
  0x2f   :  { %713 = vmatprep.subr.bf16.mxu0 %v712_v7 }
  0x30   :  { %8 = vsyncpa [#allocation3], 0  ;;  %v593_v38 = vld [vmem:[%s1222_s1 + $0x3a8] sm:$0xff]  ;;  %v595_v39 = vld [vmem:[%s1222_s1 + $0x3b8] sm:$0xff]  ;;  %v654_v40 = vpack.c.bf16 %v526_v32, %v524_v29  ;;  %v718_v41 = vpack.c.bf16 %v590_v34, %v588_v33  ;;  %v656_v42 = vpack.c.bf16 %v531_v37, %v529_v36  ;;  %v128_v19 = vlaneseq }
  0x31   :  { %651 = vmatpush1.bf16.msra.mxu1 %v650_v28  ;;  %v528_v43 = vld [vmem:[%s1222_s1 + $0x1a0] sm:$0xff]  ;;  %v530_v44 = vld [vmem:[%s1222_s1 + $0x1b0] sm:$0xff]  ;;  %v720_v46 = vpack.c.bf16 %v595_v39, %v593_v38  ;;  %v533_v48 = vld [vmem:[%s1222_s1 + $0x1c8] sm:$0xff]  ;;  %v768_v23 = vmov 1983009808   ;;  %vm490_vm1 = vcmask 1041408  }
  0x32   :  { %715 = vmatpush1.bf16.msra.mxu0 %v714_v30  ;;  %653 = vmatprep.subr.bf16.mxu1 %v652_v31  ;;  %v592_v45 = vld [vmem:[%s1222_s1 + $0x3a0] sm:$0xff]  ;;  %v594_v47 = vld [vmem:[%s1222_s1 + $0x3b0] sm:$0xff]  ;;  %v535_v49 = vld [vmem:[%s1222_s1 + $0x1d8] sm:$0xff]  ;;  %v658_v52 = vpack.c.bf16 %v530_v44, %v528_v43  ;;  %v129_v20 = vshrl.u32 %v128_v19, 7  ;;  %v483_v24 = vunpack.c.l.s4 %v768_v23  ;;  %vm491_vm2 = vcmask 519170  }
  0x33   :  { %717 = vmatprep.subr.bf16.mxu0 %v716_v35  ;;  %v597_v50 = vld [vmem:[%s1222_s1 + $0x3c8] sm:$0xff]  ;;  %v599_v51 = vld [vmem:[%s1222_s1 + $0x3d8] sm:$0xff]  ;;  %v722_v53 = vpack.c.bf16 %v594_v47, %v592_v45  ;;  %v660_v54 = vpack.c.bf16 %v535_v49, %v533_v48  ;;  %v532_v55 = vld [vmem:[%s1222_s1 + $0x1c0] sm:$0xff] }
  0x34   :  { %v534_v56 = vld [vmem:[%s1222_s1 + $0x1d0] sm:$0xff]  ;;  %v596_v57 = vld [vmem:[%s1222_s1 + $0x3c0] sm:$0xff]  ;;  %v724_v58 = vpack.c.bf16 %v599_v51, %v597_v50  ;;  %v537_v60 = vld [vmem:[%s1222_s1 + $0x1e8] sm:$0xff]  ;;  %v130_v21 = vsub.s32 0, %v129_v20  ;;  %v134_v7 = vsub.s32 1, %v129_v20  ;;  %v484_v28 = vunpack.c.0.s8 %v483_v24 }
  0x35   :  { %655 = vmatpush1.bf16.msra.mxu1 %v654_v40  ;;  %v598_v59 = vld [vmem:[%s1222_s1 + $0x3d0] sm:$0xff]  ;;  %v539_v61 = vld [vmem:[%s1222_s1 + $0x1f8] sm:$0xff]  ;;  %v601_v62 = vld [vmem:[%s1222_s1 + $0x3e8] sm:$0xff]  ;;  %v662_v0 = vpack.c.bf16 %v534_v56, %v532_v55 }
  0x36   :  { %719 = vmatpush1.bf16.msra.mxu0 %v718_v41  ;;  %657 = vmatprep.subr.bf16.mxu1 %v656_v42  ;;  %v603_v63 = vld [vmem:[%s1222_s1 + $0x3f8] sm:$0xff]  ;;  %v726_v1 = vpack.c.bf16 %v598_v59, %v596_v57  ;;  %v664_v2 = vpack.c.bf16 %v539_v61, %v537_v60  ;;  %v536_v3 = vld [vmem:[%s1222_s1 + $0x1e0] sm:$0xff]  ;;  %v538_v4 = vld [vmem:[%s1222_s1 + $0x1f0] sm:$0xff]  ;;  %v487_v36 = vsub.s32 %v484_v28, %v129_v20 }
  0x37   :  { %721 = vmatprep.subr.bf16.mxu0 %v720_v46  ;;  %v141_v5 = vld [vmem:[%s1221_s0 + $0x5] sm:$0x1]  ;;  %v728_v6 = vpack.c.bf16 %v603_v63, %v601_v62  ;;  %v602_v9 = vld [vmem:[%s1222_s1 + $0x3f0] sm:$0xff]  ;;  %v367_v10 = vld [vmem:[%s1221_s0 + $0x7] sm:$0x1]  ;;  %v666_v11 = vpack.c.bf16 %v538_v4, %v536_v3 }
  0x38   :  { %v600_v8 = vld [vmem:[%s1222_s1 + $0x3e0] sm:$0xff]  ;;  %v177_v12 = vrot.slane %v141_v5, 7  ;;  %v403_v15 = vrot.slane %v367_v10, 7  ;;  %vm492_vm3 = vmor %vm491_vm2, %vm490_vm1 }
  0x39   :  { %659 = vmatpush1.bf16.msra.mxu1 %v658_v52  ;;  %v730_v13 = vpack.c.bf16 %v602_v9, %v600_v8  ;;  %v140_v14 = vld [vmem:[%s1221_s0 + $0x1] sm:$0x1]  ;;  %v366_v16 = vld [vmem:[%s1221_s0 + $0x3] sm:$0x1]  ;;  %s769_s0 = smov [#allocation2]  }
  0x3a   :  { %723 = vmatpush1.bf16.msra.mxu0 %v722_v53  ;;  %661 = vmatprep.subr.bf16.mxu1 %v660_v54  ;;  %v178_v17 = vsel %vm53_vm0, %v177_v12, %v140_v14  ;;  %v404_v18 = vsel %vm53_vm0, %v403_v15, %v366_v16  ;;  %v15_v22 = vld [vmem:[%s1223_s2] sm:$0x3]  ;;  %s500_s15 = sshll.u32 %s769_s0, 4  ;;  %s501_s15 = int_to_ptr.vmem [resolvable:$true] %s500_s15 }
  0x3b   :  { %725 = vmatprep.subr.bf16.mxu0 %v724_v58  ;;  %v131_v25 = vrot.slane %v15_v22, %v130_v21  ;;  %v135_v26 = vrot.slane %v15_v22, %v134_v7  ;;  %s743_s2 = scalar_lea.vmem %s501_s15, 64  ;;  %p748_p1 = scmp.lt.s32.totalorder %s501_s15, %s501_s15 }
  0x3c   :  { %p744_p0 = scmp.ne.s32.totalorder %s501_s15, %s743_s2  ;;  %p749_p2 = scmp.lt.s32.totalorder %s743_s2, %s743_s2 }
  0x3d   :  { %663 = vmatpush1.bf16.msra.mxu1 %v662_v0 }
  0x3e   :  { %727 = vmatpush1.bf16.msra.mxu0 %v726_v1  ;;  %665 = vmatprep.subr.bf16.mxu1 %v664_v2  ;;  %p750_p3 = por %p749_p2, %p748_p1 }
  0x3f   :  { %729 = vmatprep.subr.bf16.mxu0 %v728_v6 }
  0x40   :  { %p751_p4 = pnand %p750_p3, %p744_p0 }
  0x41   :  { %667 = vmatpush1.bf16.msra.mxu1 %v666_v11 }
  0x42   :  { %731 = vmatpush1.bf16.msra.mxu0 %v730_v13 }
  0x44   :  { %245 = vmatmul.mubr.f32.vlgmr.msra.gmra.mrb[0].mxu1 %v178_v17 }
  0x45   :  { %471 = vmatmul.mubr.f32.vlgmr.msra.gmra.mrb[0].mxu0 %v404_v18 }
 0x117   :  { %v246_v27 = vpop.f32.mrb[0].mxu1 }
 0x118   :  { %v732_v29 = vadd.f32 %v246_v27, %v131_v25  ;;  %v472_v30 = vpop.f32.mrb[0].mxu0  ;;  %v248_v31 = vpop.f32.mrb[1].mxu1 }
 0x119   :  { %v734_v32 = vadd.f32 %v248_v31, %v135_v26  ;;  %v474_v33 = vpop.f32.mrb[1].mxu0 }
 0x11a   :  { %v733_v34 = vadd.f32 %v732_v29, %v472_v30 }
 0x11b   :  { %v735_v35 = vadd.f32 %v734_v32, %v474_v33 }
 0x11d   :  { %v481_v37 = vcombine.low %v733_v34, %v735_v35 }
 0x11f   :  { %v488_v38 = vrot.slane %v481_v37, %v487_v36 }
 0x121   :  { %493 = vst.msk [vmem:[#allocation2] sm:$0xf] %vm492_vm3, %v488_v38 }
 0x122   :  { %754 = shalt.err (!%p751_p4)
}
 0x123   :  { %s755_s18 = scalar_lea.hbm %s1224_s3, 64 }
 0x124   :  { %p756_p5 = scmp.ne.s32.totalorder %s1224_s3, %s755_s18  ;;  %p759_p6 = scmp.lt.u32.totalorder %s755_s18, %s1224_s3 }
 0x126   :  { %p761_p7 = pnand %p759_p6, %p756_p5 }
 0x128   :  { %764 = shalt.err (!%p761_p7)
}
 0x129   :  { %503 = dma.vmem_to_hbm [thread:$0]  %s501_s15, 64, %s1224_s3, [#allocation3]  }
 0x12a   :  { %765 = dma.done.wait [#allocation3], 64  }
 0x12b   :  { %766 = vsyncadd [#allocation3], 4294967232 }
 0x12c   :  { %507 = vsyncpa [#allocation3], 1 }

</bundles_post_ra>
